<compile_context>
chip_gen: v5e
topology: v5e:2x2
jax: 0.10.0
libtpu: 0.0.40
codegen_flags: <defaults>
</compile_context>

<pallas_src>
import functools

import jax
import jax.numpy as jnp
from jax.experimental import pallas as pl
from jax.experimental.pallas import tpu as pltpu


def _round_up(x, m):
    return ((x + m - 1) // m) * m


def _default_tile_n(n):
    """Large tiles to amortize ~0.35us/step, but keep >=4 grid blocks when possible."""
    t = 4096
    while t > 512 and n < 4 * t:
        t //= 2
    # Never (meaningfully) exceed the row count; keep a multiple of 8 (sublane rule).
    return min(t, _round_up(max(n, 8), 8))


def _fourier_kan_kernel(x_ref, r_ref, wc_ref, ws_ref, b_ref, o_ref, *, matmul_dtype):
    # x_ref : (TN, D)      f32   input rows (ragged final block: extra rows are garbage,
    #                            row-local, and their output store is clipped by Pallas)
    # r_ref : (D, G*D)     f32   replication/scale matrix, R[i, g*D+i] = g+1 (exact ints)
    # wc_ref: (G*D, O)     matmul_dtype   cos weights, row (g*D+i), col j = Wc[j,i,g]
    # ws_ref: (G*D, O)     matmul_dtype   sin weights
    # b_ref : (1, O)       f32   bias
    # o_ref : (TN, O)      f32
    x = x_ref[...]

    # kx[n, g*D+i] = (g+1) * x[n, i], built lane-dense on the MXU.
    # Hi/lo split keeps it exact regardless of default matmul precision: each pass
    # multiplies bf16-representable operands against exact small-int R entries and
    # every output column has exactly one nonzero contribution (no accumulation rounding).
    x_hi = x.astype(jnp.bfloat16).astype(jnp.float32)
    x_lo = x - x_hi
    r = r_ref[...]
    kx = (jnp.dot(x_hi, r, preferred_element_type=jnp.float32)
          + jnp.dot(x_lo, r, preferred_element_type=jnp.float32))

    # Single cos / sin over the lane-dense block (EUP path), then two MXU dots
    # (no concatenated f32 slab, no lane-alignment assumption on G*D).
    cos_f = jnp.cos(kx).astype(matmul_dtype)
    sin_f = jnp.sin(kx).astype(matmul_dtype)
    acc = jnp.dot(cos_f, wc_ref[...], preferred_element_type=jnp.float32)
    acc = acc + jnp.dot(sin_f, ws_ref[...], preferred_element_type=jnp.float32)

    o_ref[...] = (acc + b_ref[...]).astype(o_ref.dtype)


def pack_fourier_kan_params(fouriercoeffs, bias=None, *, matmul_dtype=jnp.bfloat16):
    """Pre-pack parameters once (outside the hot per-call path).

    fouriercoeffs: (2, output_dim, input_dim, grid_size)
    bias:          (1, output_dim) or None
    Returns (wc (G*D, O), ws (G*D, O), bias (1, O) f32, r (D, G*D) f32).
    """
    _, out_dim, in_dim, grid_size = fouriercoeffs.shape
    gd = grid_size * in_dim

    # Row (g*D + i), col j  ==  coeff[c, j, i, g].
    wc = jnp.transpose(fouriercoeffs[0].astype(jnp.float32), (2, 1, 0)).reshape(gd, out_dim)
    ws = jnp.transpose(fouriercoeffs[1].astype(jnp.float32), (2, 1, 0)).reshape(gd, out_dim)
    wc = wc.astype(matmul_dtype)
    ws = ws.astype(matmul_dtype)

    if bias is not None:
        b = bias.astype(jnp.float32).reshape(1, out_dim)
    else:
        b = jnp.zeros((1, out_dim), jnp.float32)

    # Replication/scale matrix: R[i, g*D + i'] = (g+1) * delta(i, i').
    k = jnp.arange(1, grid_size + 1, dtype=jnp.float32)          # (G,)
    eye = jnp.eye(in_dim, dtype=jnp.float32)                     # (D, D)
    r = (k[:, None, None] * eye[None, :, :]).transpose(1, 0, 2).reshape(in_dim, gd)
    return wc, ws, b, r


def fourier_kan_forward_packed(x, wc, ws, bias, r, *, tile_n=None):
    """Forward pass using pre-packed parameters."""
    *lead, in_dim = x.shape
    gd, out_dim = wc.shape

    xf = x.reshape(-1, in_dim).astype(jnp.float32)
    n = xf.shape[0]

    if tile_n is None:
        tile_n = _default_tile_n(n)
    grid = pl.cdiv(n, tile_n)   # ragged final block handled by Pallas (no wrapper pad/slice)

    kernel = functools.partial(_fourier_kan_kernel, matmul_dtype=wc.dtype)

    out = pl.pallas_call(
        kernel,
        out_shape=jax.ShapeDtypeStruct((n, out_dim), jnp.float32),
        grid=(grid,),
        in_specs=[
            pl.BlockSpec((tile_n, in_dim), lambda i: (i, 0)),
            pl.BlockSpec((in_dim, gd), lambda i: (0, 0)),        # resident
            pl.BlockSpec((gd, out_dim), lambda i: (0, 0)),       # resident
            pl.BlockSpec((gd, out_dim), lambda i: (0, 0)),       # resident
            pl.BlockSpec((1, out_dim), lambda i: (0, 0)),        # resident
        ],
        out_specs=pl.BlockSpec((tile_n, out_dim), lambda i: (i, 0)),
        compiler_params=pltpu.CompilerParams(
            dimension_semantics=("parallel",),
            vmem_limit_bytes=48 * 1024 * 1024),
    )(xf, r, wc, ws, bias)

    return out.reshape(*lead, out_dim)


def fourier_kan_forward(x, fouriercoeffs, bias=None, *, tile_n=None,
                        matmul_dtype=jnp.bfloat16):
    """Convenience wrapper: packs parameters then runs the kernel.

    For repeated calls, prefer pack_fourier_kan_params once + fourier_kan_forward_packed.
    """
    wc, ws, b, r = pack_fourier_kan_params(fouriercoeffs, bias, matmul_dtype=matmul_dtype)
    return fourier_kan_forward_packed(x, wc, ws, b, r, tile_n=tile_n)


def fourier_kan_reference(x, fouriercoeffs, bias=None):
    """Pure-JAX replica of the PyTorch forward, for verification."""
    *lead, in_dim = x.shape
    out_dim = fouriercoeffs.shape[1]
    grid_size = fouriercoeffs.shape[3]
    xf = x.reshape(-1, in_dim).astype(jnp.float32)
    k = jnp.arange(1, grid_size + 1, dtype=jnp.float32).reshape(1, 1, 1, grid_size)
    xr = xf.reshape(xf.shape[0], 1, in_dim, 1)
    c = jnp.cos(k * xr)
    s = jnp.sin(k * xr)
    y = jnp.sum(c * fouriercoeffs[0:1], axis=(-2, -1))
    y = y + jnp.sum(s * fouriercoeffs[1:2], axis=(-2, -1))
    if bias is not None:
        y = y + bias
    return y.reshape(*lead, out_dim)


if __name__ == "__main__":
    # Module config: FourierKANLayer(input_dim=16, output_dim=32, grid_size=8)
    input_dim = 16
    output_dim = 32
    grid_size = 8

    key = jax.random.PRNGKey(0)
    k_x, k_w, k_x2 = jax.random.split(key, 3)

    # Deterministic init (smooth_initialization=False):
    #   randn(2, O, D, G) / (sqrt(D) * sqrt(G)), bias = zeros(1, O)
    fouriercoeffs = (jax.random.normal(k_w, (2, output_dim, input_dim, grid_size),
                                       dtype=jnp.float32)
                     / (jnp.sqrt(jnp.float32(input_dim)) * jnp.sqrt(jnp.float32(grid_size))))
    bias = jnp.zeros((1, output_dim), jnp.float32)

    wc, ws, b_pack, r_mat = pack_fourier_kan_params(fouriercoeffs, bias,
                                                    matmul_dtype=jnp.bfloat16)
    run = jax.jit(fourier_kan_forward_packed)

    # Small shape implied by the module: x (batch=2, seq=8, input_dim=16).
    x = jax.random.normal(k_x, (2, 8, input_dim), dtype=jnp.float32)
    y = run(x, wc, ws, b_pack, r_mat)
    jax.block_until_ready(y)
    y_ref = fourier_kan_reference(x, fouriercoeffs, bias)
    assert y.shape == (2, 8, output_dim), y.shape
    assert jnp.allclose(y, y_ref, atol=5e-2, rtol=5e-2), float(jnp.max(jnp.abs(y - y_ref)))

    # Multi-tile + ragged-final-block path (no wrapper padding / row slicing).
    x2 = jax.random.normal(k_x2, (4, 160, input_dim), dtype=jnp.float32)   # N = 640 rows
    y2 = run(x2, wc, ws, b_pack, r_mat)
    jax.block_until_ready(y2)
    y2_ref = fourier_kan_reference(x2, fouriercoeffs, bias)
    assert y2.shape == (4, 160, output_dim), y2.shape
    assert jnp.allclose(y2, y2_ref, atol=5e-2, rtol=5e-2), float(jnp.max(jnp.abs(y2 - y2_ref)))

    print("KERNEL_OK")
</pallas_src>

<mosaic_0001>
module attributes {stable_mosaic.version = 11 : i64} {
  func.func @_fourier_kan_kernel(%arg0: i32, %arg1: memref<16x16xf32, #tpu.memory_space<vmem>>, %arg2: memref<16x128xf32, #tpu.memory_space<vmem>>, %arg3: memref<128x32xbf16, #tpu.memory_space<vmem>>, %arg4: memref<128x32xbf16, #tpu.memory_space<vmem>>, %arg5: memref<1x32xf32, #tpu.memory_space<vmem>>, %arg6: memref<16x32xf32, #tpu.memory_space<vmem>>) attributes {dimension_semantics = [#tpu.dimension_semantics<parallel>], iteration_bounds = array<i64: 1>, scalar_prefetch = 0 : i64, scratch_operands = 0 : i64, tpu.core_type = #tpu.core_type<tc>, window_params = [{transform_indices = @transform_0, window_bounds = array<i64: 16, 16>}, {pipeline_mode = #tpu.pipeline_mode<synchronous>, transform_indices = @transform_1, window_bounds = array<i64: 16, 128>}, {pipeline_mode = #tpu.pipeline_mode<synchronous>, transform_indices = @transform_2, window_bounds = array<i64: 128, 32>}, {pipeline_mode = #tpu.pipeline_mode<synchronous>, transform_indices = @transform_3, window_bounds = array<i64: 128, 32>}, {pipeline_mode = #tpu.pipeline_mode<synchronous>, transform_indices = @transform_4, window_bounds = array<i64: 1, 32>}, {transform_indices = @transform_5, window_bounds = array<i64: 16, 32>}]} {
    %c0 = arith.constant 0 : index
    %c0_0 = arith.constant 0 : index
    %0 = vector.load %arg1[%c0, %c0_0] : memref<16x16xf32, #tpu.memory_space<vmem>>, vector<16x16xf32>
    %1 = arith.truncf %0 : vector<16x16xf32> to vector<16x16xbf16>
    %2 = arith.extf %1 : vector<16x16xbf16> to vector<16x16xf32>
    %3 = arith.subf %0, %2 : vector<16x16xf32>
    %c0_1 = arith.constant 0 : index
    %c0_2 = arith.constant 0 : index
    %4 = vector.load %arg2[%c0_1, %c0_2] : memref<16x128xf32, #tpu.memory_space<vmem>>, vector<16x128xf32>
    %cst = arith.constant dense<0.000000e+00> : vector<16x128xf32>
    %5 = tpu.matmul %2, %4, %cst {dimension_numbers = #tpu.dot_dimension_numbers<[1], [0], [0], [1], [0, 0, 1, 1], [], []>} : vector<16x16xf32>, vector<16x128xf32>, vector<16x128xf32> -> vector<16x128xf32>
    %cst_3 = arith.constant dense<0.000000e+00> : vector<16x128xf32>
    %6 = tpu.matmul %3, %4, %cst_3 {dimension_numbers = #tpu.dot_dimension_numbers<[1], [0], [0], [1], [0, 0, 1, 1], [], []>} : vector<16x16xf32>, vector<16x128xf32>, vector<16x128xf32> -> vector<16x128xf32>
    %7 = arith.addf %5, %6 : vector<16x128xf32>
    %8 = math.cos %7 : vector<16x128xf32>
    %9 = arith.truncf %8 : vector<16x128xf32> to vector<16x128xbf16>
    %10 = math.sin %7 : vector<16x128xf32>
    %11 = arith.truncf %10 : vector<16x128xf32> to vector<16x128xbf16>
    %c0_4 = arith.constant 0 : index
    %c0_5 = arith.constant 0 : index
    %12 = vector.load %arg3[%c0_4, %c0_5] : memref<128x32xbf16, #tpu.memory_space<vmem>>, vector<128x32xbf16>
    %cst_6 = arith.constant dense<0.000000e+00> : vector<16x32xf32>
    %13 = tpu.matmul %9, %12, %cst_6 {dimension_numbers = #tpu.dot_dimension_numbers<[1], [0], [0], [1], [0, 0, 1, 1], [], []>} : vector<16x128xbf16>, vector<128x32xbf16>, vector<16x32xf32> -> vector<16x32xf32>
    %c0_7 = arith.constant 0 : index
    %c0_8 = arith.constant 0 : index
    %14 = vector.load %arg4[%c0_7, %c0_8] : memref<128x32xbf16, #tpu.memory_space<vmem>>, vector<128x32xbf16>
    %cst_9 = arith.constant dense<0.000000e+00> : vector<16x32xf32>
    %15 = tpu.matmul %11, %14, %cst_9 {dimension_numbers = #tpu.dot_dimension_numbers<[1], [0], [0], [1], [0, 0, 1, 1], [], []>} : vector<16x128xbf16>, vector<128x32xbf16>, vector<16x32xf32> -> vector<16x32xf32>
    %16 = arith.addf %13, %15 : vector<16x32xf32>
    %c0_10 = arith.constant 0 : index
    %c0_11 = arith.constant 0 : index
    %17 = vector.load %arg5[%c0_10, %c0_11] : memref<1x32xf32, #tpu.memory_space<vmem>>, vector<1x32xf32>
    %18 = vector.broadcast %17 : vector<1x32xf32> to vector<16x32xf32>
    %19 = arith.addf %16, %18 : vector<16x32xf32>
    %c0_12 = arith.constant 0 : index
    %c0_13 = arith.constant 0 : index
    %20 = vector.load %arg6[%c0_12, %c0_13] : memref<16x32xf32, #tpu.memory_space<vmem>>, vector<16x32xf32>
    tpu.vector_store %arg6[%c0_12, %c0_13], %19 {strides = array<i32>} : memref<16x32xf32, #tpu.memory_space<vmem>>, vector<16x32xf32>,
    return
  }
  func.func @transform_0(%arg0: i32) -> (i32, i32) {
    %c0_i32 = arith.constant 0 : i32
    %c0_i32_0 = arith.constant 0 : i32
    return %arg0, %c0_i32 : i32, i32
  }
  func.func @transform_1(%arg0: i32) -> (i32, i32) {
    %c0_i32 = arith.constant 0 : i32
    %c0_i32_0 = arith.constant 0 : i32
    %c0_i32_1 = arith.constant 0 : i32
    return %c0_i32, %c0_i32_0 : i32, i32
  }
  func.func @transform_2(%arg0: i32) -> (i32, i32) {
    %c0_i32 = arith.constant 0 : i32
    %c0_i32_0 = arith.constant 0 : i32
    %c0_i32_1 = arith.constant 0 : i32
    return %c0_i32, %c0_i32_0 : i32, i32
  }
  func.func @transform_3(%arg0: i32) -> (i32, i32) {
    %c0_i32 = arith.constant 0 : i32
    %c0_i32_0 = arith.constant 0 : i32
    %c0_i32_1 = arith.constant 0 : i32
    return %c0_i32, %c0_i32_0 : i32, i32
  }
  func.func @transform_4(%arg0: i32) -> (i32, i32) {
    %c0_i32 = arith.constant 0 : i32
    %c0_i32_0 = arith.constant 0 : i32
    %c0_i32_1 = arith.constant 0 : i32
    return %c0_i32, %c0_i32_0 : i32, i32
  }
  func.func @transform_5(%arg0: i32) -> (i32, i32) {
    %c0_i32 = arith.constant 0 : i32
    %c0_i32_0 = arith.constant 0 : i32
    return %arg0, %c0_i32 : i32, i32
  }
}

</mosaic_0001>

<bundles_post_ra>
// kernel: fourier_kan_forward_packed.1
= control target key start
LH: loop header
LB: loop body
LE: loop exit
PB: predicated region body
PF: predicated region fallthrough
CT: control target
= control target key end

     0   :  { %s1358_s0 = inlined_call_operand.vmem [shape: f32[16,16], index: 0, kind: input, shape index: {}]   ;;  %s1359_s1 = inlined_call_operand.vmem [shape: f32[16,128], index: 1, kind: input, shape index: {}]   ;;  %s1360_s2 = inlined_call_operand.vmem [shape: bf16[128,32], index: 2, kind: input, shape index: {}]   ;;  %s1361_s3 = inlined_call_operand.vmem [shape: bf16[128,32], index: 3, kind: input, shape index: {}]   ;;  %s1362_s4 = inlined_call_operand.vmem [shape: f32[1,32], index: 4, kind: input, shape index: {}]   ;;  %s1363_s5 = inlined_call_operand.hbm [shape: f32[16,32], index: 5, kind: output, shape index: {}]  }
   0x1   :  { %v30_v0 = vld [vmem:[%s1359_s1 + $0x8] sm:$0xff]  ;;  %v29_v1 = vld [vmem:[%s1359_s1] sm:$0xff] }
   0x2   :  { %v21_v2 = vld [vmem:[%s1358_s0] sm:$0xff]  ;;  %52 = vmatpush.msra.mxu0 %v30_v0  ;;  %81 = vmatpush.msra.mxu1 %v30_v0  ;;  %v22_v4 = vld [vmem:[%s1358_s0 + $0x8] sm:$0xff] }
   0x3   :  { %v23_v3 = vpack.c.bf16 %v21_v2, %v21_v2 }
   0x4   :  { %10 = vsyncpa [#allocation3], 0  ;;  %vm31_vm0 = vcmask 130048   ;;  %53 = vmatpush.msra.mxu0 %v29_v1  ;;  %82 = vmatpush.msra.mxu1 %v29_v1  ;;  %v24_v6 = vpack.c.bf16 %v22_v4, %v22_v4  ;;  %v1026_v30 = vmov 683565275   ;;  %v988_v41 = vld [vmem:[%s1361_s3 + $0x38] sm:$0xff] }
   0x5   :  { %v25_v5 = vunpack.c.l.bf16 %v23_v3  ;;  %v1027_v32 = vmov 2475754826   ;;  %v1028_v36 = vmov 2131351028   ;;  %v1029_v39 = vmov 2102212464   ;;  %790 = vmatpush.bf16.msra.mxu2 %v988_v41 }
   0x6   :  { %v26_v8 = vunpack.c.l.bf16 %v24_v6  ;;  %v980_v42 = vld [vmem:[%s1360_s2 + $0x38] sm:$0xff]  ;;  %v1030_v44 = vmov 920167782   ;;  %v1031_v47 = vmov 1326507024   ;;  %v987_v53 = vld [vmem:[%s1361_s3 + $0x30] sm:$0xff] }
   0x7   :  { %v27_v7 = vsub.f32 %v21_v2, %v25_v5  ;;  %895 = vmatmul.msk.f32.vlgmr.msra.gmra.mxu1 %vm31_vm0, %v25_v5  ;;  %852 = vmatpush.bf16.msra.mxu3 %v980_v42  ;;  %v979_v54 = vld [vmem:[%s1360_s2 + $0x30] sm:$0xff]  ;;  %v986_v2 = vld [vmem:[%s1361_s3 + $0x28] sm:$0xff]  ;;  %s1033_s29 = smov [#allocation2]   ;;  %s881_s8 = sshll.u32 %s1363_s5, 4  ;;  %s882_s8 = int_to_ptr.hbm [resolvable:$true] %s881_s8 }
   0x8   :  { %v28_v9 = vsub.f32 %v22_v4, %v26_v8  ;;  %v978_v4 = vld [vmem:[%s1360_s2 + $0x28] sm:$0xff]  ;;  %s879_s30 = sshll.u32 %s1033_s29, 4  ;;  %s1035_s9 = smov 8   ;;  %s880_s30 = int_to_ptr.vmem [resolvable:$true] %s879_s30 }
   0x9   :  { %893 = vmatmul.msk.f32.vlgmr.msra.gmra.mxu0 %vm31_vm0, %v27_v7  ;;  %791 = vmatpush.bf16.msra.mxu2 %v987_v53 }
   0xb   :  { %853 = vmatpush.bf16.msra.mxu3 %v979_v54 }
   0xd   :  { %792 = vmatpush.bf16.msra.mxu2 %v986_v2 }
   0xf   :  { %896 = vmatmul.msk.f32.gmra.mxu1 %vm31_vm0, %v26_v8  ;;  %854 = vmatpush.bf16.msra.mxu3 %v978_v4  ;;  %v982_v4 = vld [vmem:[%s1361_s3 + $0x8] sm:$0xff] }
  0x11   :  { %894 = vmatmul.msk.f32.gmra.mxu0 %vm31_vm0, %v28_v9 }
  0x84   :  { %v84_v10 = vpop.f32.mrf.mxu1 }
  0x86   :  { %v55_v11 = vpop.f32.mrf.mxu0 }
  0x87   :  { %v1078_v12 = vadd.f32 %v84_v10, %v55_v11 }
  0x89   :  { %v93_v13 = vand.u32 2139095040, %v1078_v12  ;;  %v90_v16 = vand.u32 2147483647, %v1078_v12 }
  0x8b   :  { %v94_v14 = vshrl.u32 %v93_v13, 23  ;;  %v97_v21 = vand.u32 8388607, %v90_v16 }
  0x8c   :  { %v87_v15 = vpop.f32.mrf.mxu1 }
  0x8d   :  { %v897_v17 = vadd.s32 4294967169, %v94_v14  ;;  %v98_v26 = vor.u32 8388608, %v97_v21  ;;  %v977_v21 = vld [vmem:[%s1360_s2 + $0x20] sm:$0xff] }
  0x8e   :  { %v58_v18 = vpop.f32.mrf.mxu0  ;;  %855 = vmatpush.bf16.msra.mxu3 %v977_v21 }
  0x8f   :  { %v100_v19 = vadd.s32 1, %v897_v17  ;;  %v1082_v20 = vadd.f32 %v87_v15, %v58_v18  ;;  %v1119_v58 = vshll.u32 %v98_v26, 8  ;;  %v985_v15 = vld [vmem:[%s1361_s3 + $0x20] sm:$0xff] }
  0x90   :  { %793 = vmatpush.bf16.msra.mxu2 %v985_v15 }
  0x91   :  { %vm101_vm1 = vcmp.gt.s32.totalorder %v100_v19, 0  ;;  %v244_v23 = vand.u32 2147483647, %v1082_v20  ;;  %v247_v24 = vand.u32 2139095040, %v1082_v20  ;;  %v1143_v6 = vand.u32 65535, %v1119_v58 }
  0x92   :  { %v102_v22 = vsel %vm101_vm1, %v100_v19, 0  ;;  %v1167_v19 = vshrl.u32 %v1119_v58, 16 }
  0x93   :  { %v104_v25 = vand.u32 31, %v102_v22  ;;  %v248_v28 = vshrl.u32 %v247_v24, 23  ;;  %v1088_v29 = vshrl.u32 %v102_v22, 5  ;;  %v251_v34 = vand.u32 8388607, %v244_v23 }
  0x95   :  { %v105_v27 = vsub.s32 32, %v104_v25  ;;  %v107_v31 = vshll.u32 %v1026_v30, %v104_v25  ;;  %v110_v33 = vshll.u32 %v1027_v32, %v104_v25  ;;  %v113_v38 = vshll.u32 %v1028_v36, %v104_v25 }
  0x96   :  { %v116_v43 = vshll.u32 %v1029_v39, %v104_v25  ;;  %v119_v46 = vshll.u32 %v1030_v44, %v104_v25  ;;  %v900_v52 = vadd.s32 4294967169, %v248_v28  ;;  %vm122_vm2 = vcmp.lt.s32.totalorder %v1088_v29, 1 }
  0x97   :  { %v108_v35 = vshrl.u32 %v1027_v32, %v105_v27  ;;  %v111_v37 = vshrl.u32 %v1028_v36, %v105_v27  ;;  %v114_v40 = vshrl.u32 %v1029_v39, %v105_v27  ;;  %v117_v45 = vshrl.u32 %v1030_v44, %v105_v27 }
  0x98   :  { %v120_v48 = vshrl.u32 %v1031_v47, %v105_v27  ;;  %vm124_vm3 = vcmp.lt.s32.totalorder %v1088_v29, 3  ;;  %vm125_vm4 = vcmp.lt.s32.totalorder %v1088_v29, 4  ;;  %v252_v61 = vor.u32 8388608, %v251_v34 }
  0x99   :  { %v109_v49 = vor.u32 %v108_v35, %v107_v31  ;;  %v112_v50 = vor.u32 %v111_v37, %v110_v33  ;;  %v115_v51 = vor.u32 %v114_v40, %v113_v38  ;;  %v118_v55 = vor.u32 %v117_v45, %v116_v43  ;;  %v984_v38 = vld [vmem:[%s1361_s3 + $0x18] sm:$0xff] }
  0x9a   :  { %v121_v56 = vor.u32 %v120_v48, %v119_v46  ;;  %v254_v62 = vadd.s32 1, %v900_v52  ;;  %vm123_vm5 = vcmp.lt.s32.totalorder %v1088_v29, 2  ;;  %v106_v9 = vshrl.u32 %v1026_v30, %v105_v27  ;;  %v976_v46 = vld [vmem:[%s1360_s2 + $0x18] sm:$0xff]  ;;  %794 = vmatpush.bf16.msra.mxu2 %v984_v38  ;;  %v981_v29 = vld [vmem:[%s1361_s3] sm:$0xff] }
  0x9b   :  { %v134_v57 = vsel %vm122_vm2, %v112_v50, %v115_v51  ;;  %v131_v59 = vsel %vm125_vm4, %v118_v55, 920167782  ;;  %v130_v63 = vsel %vm122_vm2, %v109_v49, %v112_v50  ;;  %v127_v5 = vsel %vm125_vm4, %v115_v51, 2102212464  ;;  %856 = vmatpush.bf16.msra.mxu3 %v976_v46 }
  0x9c   :  { %v135_v60 = vsel %vm125_vm4, %v121_v56, 1326507024  ;;  %v132_v0 = vsel %vm124_vm3, %v115_v51, %v131_v59  ;;  %vm255_vm6 = vcmp.gt.s32.totalorder %v254_v62, 0  ;;  %v1150_v13 = vshll.u32 %v252_v61, 8 }
  0x9d   :  { %v136_v1 = vsel %vm124_vm3, %v118_v55, %v135_v60  ;;  %v1148_v10 = vsel %vm123_vm5, %v130_v63, %v132_v0  ;;  %v256_v11 = vsel %vm255_vm6, %v254_v62, 0  ;;  %v1160_v17 = vsel %vm122_vm2, %v106_v9, %v109_v49 }
  0x9e   :  { %v137_v3 = vsel %vm123_vm5, %v134_v57, %v136_v1  ;;  %v1164_v18 = vsel %vm124_vm3, %v112_v50, %v127_v5  ;;  %v163_v25 = vand.u32 65535, %v1148_v10  ;;  %v258_v26 = vand.u32 31, %v256_v11 }
  0x9f   :  { %v141_v7 = vand.u32 65535, %v137_v3  ;;  %v142_v8 = vshrl.u32 %v137_v3, 16  ;;  %v164_v28 = vshrl.u32 %v1148_v10, 16  ;;  %v1180_v31 = vand.u32 65535, %v1150_v13 }
  0xa0   :  { %v1183_v33 = vshrl.u32 %v1150_v13, 16  ;;  %v1186_v35 = vshrl.u32 %v256_v11, 5  ;;  %v1188_v37 = vsub.s32 32, %v258_v26  ;;  %v1032_v40 = vmov 0   ;;  %v974_v11 = vld [vmem:[%s1360_s2 + $0x8] sm:$0xff] }
  0xa1   :  { %v1153_v14 = vmul.u32 %v142_v8, %v1143_v6  ;;  %v143_v22 = vmul.u32 %v141_v7, %v1143_v6  ;;  %v1176_v27 = vmul.u32 %v141_v7, %v1167_v19  ;;  %v146_v34 = vmul.u32 %v142_v8, %v1167_v19 }
  0xa2   :  { %v261_v43 = vshll.u32 %v1026_v30, %v258_v26  ;;  %v264_v45 = vshll.u32 %v1027_v32, %v258_v26  ;;  %v262_v48 = vshrl.u32 %v1027_v32, %v1188_v37  ;;  %v265_v49 = vshrl.u32 %v1028_v36, %v1188_v37 }
  0xa3   :  { %v147_v24 = vshll.u32 %v1153_v14, 16  ;;  %v267_v50 = vshll.u32 %v1028_v36, %v258_v26  ;;  %v270_v51 = vshll.u32 %v1029_v39, %v258_v26  ;;  %v268_v52 = vshrl.u32 %v1029_v39, %v1188_v37  ;;  %v983_v36 = vld [vmem:[%s1361_s3 + $0x10] sm:$0xff] }
  0xa4   :  { %v271_v53 = vshrl.u32 %v1030_v44, %v1188_v37  ;;  %v273_v54 = vshll.u32 %v1030_v44, %v258_v26  ;;  %v274_v55 = vshrl.u32 %v1031_v47, %v1188_v37  ;;  %v149_v32 = vshll.u32 %v1176_v27, 16  ;;  %v975_v44 = vld [vmem:[%s1360_s2 + $0x10] sm:$0xff]  ;;  %795 = vmatpush.bf16.msra.mxu2 %v983_v36 }
  0xa5   :  { %vm151_vm7 = vc.u32 %v143_v22, %v147_v24  ;;  %v153_v42 = vadd.s32 %v147_v24, %v143_v22  ;;  %v1213_v57 = vor.u32 %v262_v48, %v261_v43  ;;  %v1215_v59 = vor.u32 %v265_v49, %v264_v45  ;;  %857 = vmatpush.bf16.msra.mxu3 %v975_v44 }
  0xa6   :  { %v152_v41 = vsel %vm151_vm7, 1, %v1032_v40  ;;  %v1220_v39 = vor.u32 %v268_v52, %v267_v50  ;;  %v272_v60 = vor.u32 %v271_v53, %v270_v51  ;;  %v275_v61 = vor.u32 %v274_v55, %v273_v54 }
  0xa7   :  { %v154_v56 = vadd.s32 %v152_v41, %v146_v34  ;;  %vm276_vm8 = vcmp.lt.s32.totalorder %v1186_v35, 1  ;;  %v1229_v47 = vmul.u32 %v164_v28, %v1143_v6  ;;  %vm279_vm9 = vcmp.lt.s32.totalorder %v1186_v35, 4 }
  0xa8   :  { %v284_v62 = vsel %vm276_vm8, %v1213_v57, %v1215_v59  ;;  %vm155_vm10 = vc.u32 %v153_v42, %v149_v32  ;;  %vm278_vm11 = vcmp.lt.s32.totalorder %v1186_v35, 3  ;;  %v285_v63 = vsel %vm279_vm9, %v272_v60, 920167782  ;;  %796 = vmatpush.bf16.msra.mxu2 %v982_v4 }
  0xa9   :  { %v288_v0 = vsel %vm276_vm8, %v1215_v59, %v1220_v39  ;;  %v289_v1 = vsel %vm279_vm9, %v275_v61, 1326507024  ;;  %vm277_vm12 = vcmp.lt.s32.totalorder %v1186_v35, 2  ;;  %v286_v2 = vsel %vm278_vm11, %v1220_v39, %v285_v63  ;;  %858 = vmatpush.bf16.msra.mxu3 %v974_v11 }
  0xaa   :  { %v290_v3 = vsel %vm278_vm11, %v272_v60, %v289_v1  ;;  %v156_v5 = vsel %vm155_vm10, 1, %v1032_v40  ;;  %v1258_v7 = vmul.u32 %v163_v25, %v1167_v19  ;;  %v287_v8 = vsel %vm277_vm12, %v284_v62, %v286_v2 }
  0xab   :  { %v291_v9 = vsel %vm277_vm12, %v288_v0, %v290_v3  ;;  %v158_v15 = vadd.s32 %v156_v5, %v154_v56  ;;  %v318_v24 = vshrl.u32 %v287_v8, 16  ;;  %v169_v26 = vshll.u32 %v1229_v47, 16 }
  0xac   :  { %v295_v21 = vand.u32 65535, %v291_v9  ;;  %v296_v22 = vshrl.u32 %v291_v9, 16  ;;  %v1272_v34 = vsel %vm123_vm5, %v1160_v17, %v1164_v18  ;;  %v317_v38 = vand.u32 65535, %v287_v8  ;;  %797 = vmatpush.bf16.msra.mxu2 %v981_v29 }
  0xad   :  { %v148_v41 = vshrl.u32 %v1153_v14, 16  ;;  %v165_v42 = vmul.u32 %v163_v25, %v1143_v6  ;;  %v168_v43 = vmul.u32 %v164_v28, %v1167_v19  ;;  %v320_v17 = vmul.u32 %v318_v24, %v1180_v31  ;;  %v973_v6 = vld [vmem:[%s1360_s2] sm:$0xff] }
  0xae   :  { %v298_v45 = vmul.u32 %v296_v22, %v1180_v31  ;;  %v299_v46 = vmul.u32 %v295_v21, %v1183_v33  ;;  %v150_v14 = vshrl.u32 %v1176_v27, 16  ;;  %v171_v18 = vshll.u32 %v1258_v7, 16  ;;  %859 = vmatpush.bf16.msra.mxu3 %v973_v6 }
  0xaf   :  { %v159_v10 = vadd.s32 %v158_v15, %v148_v41  ;;  %v297_v19 = vmul.u32 %v295_v21, %v1180_v31  ;;  %v300_v25 = vmul.u32 %v296_v22, %v1183_v33  ;;  %vm173_vm13 = vc.u32 %v165_v42, %v169_v26 }
  0xb0   :  { %v301_v28 = vshll.u32 %v298_v45, 16  ;;  %v303_v48 = vshll.u32 %v299_v46, 16  ;;  %v321_v49 = vmul.u32 %v317_v38, %v1183_v33  ;;  %v174_v50 = vsel %vm173_vm13, 1, %v1032_v40 }
  0xb1   :  { %v175_v51 = vadd.s32 %v169_v26, %v165_v42  ;;  %v176_v53 = vadd.s32 %v174_v50, %v168_v43  ;;  %v323_v27 = vshll.u32 %v320_v17, 16  ;;  %v319_v55 = vmul.u32 %v317_v38, %v1180_v31 }
  0xb2   :  { %vm305_vm14 = vc.u32 %v297_v19, %v301_v28  ;;  %v307_v52 = vadd.s32 %v301_v28, %v297_v19  ;;  %v170_v32 = vshrl.u32 %v1229_v47, 16  ;;  %v322_v36 = vmul.u32 %v318_v24, %v1183_v33 }
  0xb3   :  { %v306_v54 = vsel %vm305_vm14, 1, %v1032_v40  ;;  %vm177_vm15 = vc.u32 %v175_v51, %v171_v18  ;;  %v160_v61 = vadd.s32 %v159_v10, %v150_v14  ;;  %v302_v62 = vshrl.u32 %v298_v45, 16 }
  0xb4   :  { %v308_v56 = vadd.s32 %v306_v54, %v300_v25  ;;  %v178_v60 = vsel %vm177_vm15, 1, %v1032_v40  ;;  %vm309_vm0 = vc.u32 %v307_v52, %v303_v48  ;;  %v325_v1 = vshll.u32 %v321_v49, 16 }
  0xb5   :  { %v180_v44 = vadd.s32 %v178_v60, %v176_v53  ;;  %v310_v63 = vsel %vm309_vm0, 1, %v1032_v40  ;;  %vm327_vm1 = vc.u32 %v319_v55, %v323_v27  ;;  %v329_v2 = vadd.s32 %v323_v27, %v319_v55 }
  0xb6   :  { %v312_v0 = vadd.s32 %v310_v63, %v308_v56  ;;  %v281_v31 = vsel %vm279_vm9, %v1220_v39, 2102212464  ;;  %v172_v47 = vshrl.u32 %v1258_v7, 16  ;;  %v328_v33 = vsel %vm327_vm1, 1, %v1032_v40 }
  0xb7   :  { %v181_v3 = vadd.s32 %v180_v44, %v170_v32  ;;  %v179_v4 = vadd.s32 %v175_v51, %v171_v18  ;;  %v330_v8 = vadd.s32 %v328_v33, %v322_v36  ;;  %vm331_vm2 = vc.u32 %v329_v2, %v325_v1 }
  0xb8   :  { %v313_v5 = vadd.s32 %v312_v0, %v302_v62  ;;  %v260_v9 = vshrl.u32 %v1026_v30, %v1188_v37  ;;  %v304_v15 = vshrl.u32 %v299_v46, 16  ;;  %v332_v21 = vsel %vm331_vm2, 1, %v1032_v40 }
  0xb9   :  { %v182_v11 = vadd.s32 %v181_v3, %v172_v47  ;;  %vm185_vm3 = vc.u32 %v160_v61, %v179_v4  ;;  %v324_v22 = vshrl.u32 %v320_v17, 16  ;;  %v334_v24 = vadd.s32 %v332_v21, %v330_v8 }
  0xba   :  { %v280_v39 = vsel %vm276_vm8, %v260_v9, %v1213_v57  ;;  %v282_v7 = vsel %vm278_vm11, %v1215_v59, %v281_v31  ;;  %v314_v38 = vadd.s32 %v313_v5, %v304_v15  ;;  %v183_v30 = vmul.u32 %v1119_v58, %v1272_v34 }
  0xbb   :  { %v186_v26 = vadd.s32 1, %v182_v11  ;;  %v326_v37 = vshrl.u32 %v321_v49, 16  ;;  %v335_v41 = vadd.s32 %v334_v24, %v324_v22  ;;  %v333_v40 = vadd.s32 %v329_v2, %v325_v1 }
  0xbc   :  { %v283_v43 = vsel %vm277_vm12, %v280_v39, %v282_v7  ;;  %v184_v53 = vadd.s32 %v179_v4, %v160_v61  ;;  %vm92_vm9 = vcmp.lt.s32.totalorder %v1078_v12, 0  ;;  %vm1327_vm10 = vcmp.le.f32.partialorder %v90_v16, 0.7853982 }
  0xbd   :  { %v187_v42 = vsel %vm185_vm3, %v186_v26, %v182_v11  ;;  %v336_v46 = vadd.s32 %v335_v41, %v326_v37  ;;  %vm339_vm4 = vc.u32 %v314_v38, %v333_v40  ;;  %v337_v17 = vmul.u32 %v1150_v13, %v283_v43 }
  0xbe   :  { %v188_v45 = vadd.s32 %v187_v42, %v183_v30  ;;  %v338_v63 = vadd.s32 %v333_v40, %v314_v38  ;;  %vm246_vm11 = vcmp.lt.s32.totalorder %v1082_v20, 0  ;;  %vm245_vm12 = vcmp.le.f32.partialorder %v244_v23, 0.7853982 }
  0xbf   :  { %v340_v29 = vadd.s32 1, %v336_v46 }
  0xc0   :  { %v189_v57 = vadd.s32 536870912, %v188_v45 }
  0xc1   :  { %v341_v6 = vsel %vm339_vm4, %v340_v29, %v336_v46 }
  0xc2   :  { %v190_v59 = vshrl.u32 %v189_v57, 30  ;;  %v342_v14 = vadd.s32 %v341_v6, %v337_v17 }
  0xc4   :  { %v191_v10 = vshll.u32 %v190_v59, 30  ;;  %v343_v18 = vadd.s32 536870912, %v342_v14  ;;  %v214_v26 = vsub.s32 4, %v190_v59 }
  0xc6   :  { %v192_v58 = vsub.s32 %v188_v45, %v191_v10  ;;  %v1321_v34 = vshrl.u32 %v343_v18, 30  ;;  %v215_v40 = vsel %vm92_vm9, %v214_v26, %v190_v59 }
  0xc8   :  { %vm193_vm5 = vcmp.lt.s32.totalorder %v192_v58, 0  ;;  %v194_v19 = vsub.s32 0, %v192_v58  ;;  %v345_v35 = vshll.u32 %v1321_v34, 30  ;;  %v368_v16 = vsub.s32 4, %v1321_v34 }
  0xca   :  { %v195_v25 = vsel %vm193_vm5, %v194_v19, %v192_v58  ;;  %v346_v48 = vsub.s32 %v342_v14, %v345_v35  ;;  %v369_v6 = vsel %vm246_vm11, %v368_v16, %v1321_v34  ;;  %v217_v14 = vsel %vm1327_vm10, 0, %v215_v40 }
  0xcb   :  { %v196_v28 = vclz %v195_v25  ;;  %v371_v19 = vsel %vm245_vm12, 0, %v369_v6 }
  0xcc   :  { %vm347_vm6 = vcmp.lt.s32.totalorder %v346_v48, 0  ;;  %v348_v50 = vsub.s32 0, %v346_v48 }
  0xcd   :  { %v898_v49 = vadd.s32 4294967294, %v196_v28 }
  0xce   :  { %v349_v13 = vsel %vm347_vm6, %v348_v50, %v346_v48 }
  0xcf   :  { %vm899_vm7 = vcmp.lt.s32.totalorder %v898_v49, 0  ;;  %v350_v52 = vclz %v349_v13 }
  0xd0   :  { %v199_v51 = vsel %vm899_vm7, 0, %v898_v49 }
  0xd1   :  { %v200_v27 = vsub.s32 32, %v199_v51  ;;  %v204_v54 = vsub.s32 4294967266, %v199_v51  ;;  %v901_v55 = vadd.s32 4294967294, %v350_v52  ;;  %v201_v32 = vshll.u32 %v192_v58, %v199_v51 }
  0xd2   :  { %v698_v51 = vadd.s32 3, %v371_v19 }
  0xd3   :  { %v202_v56 = vshrl.u32 %v184_v53, %v200_v27  ;;  %v205_v36 = vadd.s32 127, %v204_v54  ;;  %vm902_vm8 = vcmp.lt.s32.totalorder %v901_v55, 0  ;;  %v234_v27 = vand.u32 3, %v217_v14 }
  0xd4   :  { %v353_v62 = vsel %vm902_vm8, 0, %v901_v55 }
  0xd5   :  { %v203_v60 = vor.u32 %v202_v56, %v201_v32  ;;  %v206_v44 = vshll.u32 %v205_v36, 23  ;;  %v354_v0 = vsub.s32 32, %v353_v62  ;;  %v358_v1 = vsub.s32 4294967266, %v353_v62 }
  0xd6   :  { %v355_v31 = vshll.u32 %v346_v48, %v353_v62  ;;  %v543_v48 = vadd.s32 3, %v217_v14  ;;  %vm235_vm13 = vcmp.lt.s32.totalorder %v234_v27, 2  ;;  %vm236_vm0 = vcmp.eq.s32.totalorder %v234_v27, 0 }
  0xd7   :  { %v207_v2 = vor.u32 4788187, %v206_v44  ;;  %v356_v47 = vshrl.u32 %v338_v63, %v354_v0  ;;  %v359_v3 = vadd.s32 127, %v358_v1  ;;  %v210_v5 = vcvt.s32.f32 %v203_v60 }
  0xd8   :  { %v544_v55 = vand.u32 3, %v543_v48  ;;  %v699_v60 = vand.u32 3, %v698_v51  ;;  %v388_v44 = vand.u32 3, %v371_v19  ;;  %vm239_vm1 = vcmp.eq.s32.totalorder %v234_v27, 2 }
  0xd9   :  { %v208_v33 = vand.u32 2147483647, %v207_v2  ;;  %v357_v61 = vor.u32 %v356_v47, %v355_v31  ;;  %v360_v4 = vshll.u32 %v359_v3, 23 }
  0xda   :  { %vm545_vm14 = vcmp.lt.s32.totalorder %v544_v55, 2  ;;  %vm546_vm15 = vcmp.eq.s32.totalorder %v544_v55, 0  ;;  %vm549_vm2 = vcmp.eq.s32.totalorder %v544_v55, 2  ;;  %vm700_vm3 = vcmp.lt.s32.totalorder %v699_v60, 2 }
  0xdb   :  { %v211_v8 = vmul.f32 %v210_v5, %v208_v33  ;;  %v361_v9 = vor.u32 4788187, %v360_v4  ;;  %v364_v21 = vcvt.s32.f32 %v357_v61  ;;  %vm389_vm4 = vcmp.lt.s32.totalorder %v388_v44, 2 }
  0xdc   :  { %vm390_vm5 = vcmp.eq.s32.totalorder %v388_v44, 0  ;;  %vm701_vm6 = vcmp.eq.s32.totalorder %v699_v60, 0  ;;  %vm704_vm7 = vcmp.eq.s32.totalorder %v699_v60, 2  ;;  %vm393_vm8 = vcmp.eq.s32.totalorder %v388_v44, 2 }
  0xdd   :  { %v212_v11 = vxor.u32 2147483648, %v211_v8  ;;  %v362_v15 = vand.u32 2147483647, %v361_v9 }
  0xdf   :  { %v213_v24 = vsel %vm92_vm9, %v212_v11, %v211_v8  ;;  %v365_v7 = vmul.f32 %v364_v21, %v362_v15  ;;  %vm233_vm9 = vweird.f32 %v1078_v12 }
  0xe0   :  { %v216_v39 = vsel %vm1327_vm10, %v1078_v12, %v213_v24  ;;  %vm387_vm10 = vweird.f32 %v1082_v20 }
  0xe1   :  { %v218_v38 = vmul.f32 %v216_v39, %v216_v39  ;;  %v366_v30 = vxor.u32 2147483648, %v365_v7 }
  0xe3   :  { %v219_v37 = vmul.f32 -0.001358992, %v218_v38  ;;  %v226_v41 = vmul.f32 -0.00019511016, %v218_v38  ;;  %v367_v42 = vsel %vm246_vm11, %v366_v30, %v365_v7  ;;  %vm872_vm11 = vcmask 261120  }
  0xe4   :  { %v370_v46 = vsel %vm245_vm12, %v1082_v20, %v367_v42 }
  0xe5   :  { %v220_v43 = vadd.f32 0.041655596, %v219_v37  ;;  %v227_v45 = vadd.f32 0.008332121, %v226_v41  ;;  %v372_v57 = vmul.f32 %v370_v46, %v370_v46  ;;  %v999_v37 = vld [vmem:[%s1362_s4] ss:$0 sm:$0xff] }
  0xe6   :  { %s1034_s4 = smov 128  }
  0xe7   :  { %v221_v29 = vmul.f32 %v220_v43, %v218_v38  ;;  %v228_v17 = vmul.f32 %v227_v45, %v218_v38  ;;  %v373_v10 = vmul.f32 -0.001358992, %v372_v57  ;;  %v380_v18 = vmul.f32 -0.00019511016, %v372_v57 }
  0xe9   :  { %v222_v58 = vadd.f32 -0.4999988, %v221_v29  ;;  %v229_v23 = vadd.f32 -0.16666654, %v228_v17  ;;  %v374_v35 = vadd.f32 0.041655596, %v373_v10 }
  0xea   :  { %v381_v25 = vadd.f32 0.008332121, %v380_v18 }
  0xeb   :  { %v223_v59 = vmul.f32 %v222_v58, %v218_v38  ;;  %v230_v28 = vmul.f32 %v229_v23, %v218_v38  ;;  %v375_v49 = vmul.f32 %v374_v35, %v372_v57 }
  0xec   :  { %v382_v50 = vmul.f32 %v381_v25, %v372_v57 }
  0xed   :  { %v231_v13 = vadd.f32 1.0, %v230_v28  ;;  %v224_v52 = vadd.f32 1.0, %v223_v59  ;;  %v376_v53 = vadd.f32 -0.4999988, %v375_v49 }
  0xee   :  { %v383_v34 = vadd.f32 -0.16666654, %v382_v50 }
  0xef   :  { %v232_v54 = vmul.f32 %v231_v13, %v216_v39  ;;  %v377_v32 = vmul.f32 %v376_v53, %v372_v57  ;;  %v240_v62 = vxor.u32 2147483648, %v224_v52 }
  0xf0   :  { %v384_v56 = vmul.f32 %v383_v34, %v372_v57 }
  0xf1   :  { %v237_v36 = vxor.u32 2147483648, %v232_v54  ;;  %v378_v63 = vadd.f32 1.0, %v377_v32  ;;  %v551_v33 = vsel %vm549_vm2, %v240_v62, %v232_v54  ;;  %v241_v5 = vsel %vm239_vm1, %v240_v62, %v232_v54 }
  0xf2   :  { %v385_v0 = vadd.f32 1.0, %v384_v56 }
  0xf3   :  { %v394_v2 = vxor.u32 2147483648, %v378_v63  ;;  %v548_v31 = vsel %vm546_vm15, %v224_v52, %v237_v36  ;;  %v238_v47 = vsel %vm236_vm0, %v224_v52, %v237_v36 }
  0xf4   :  { %v386_v1 = vmul.f32 %v385_v0, %v370_v46  ;;  %v552_v61 = vsel %vm545_vm14, %v548_v31, %v551_v33  ;;  %v242_v4 = vsel %vm235_vm13, %v238_v47, %v241_v5 }
  0xf5   :  { %v553_v24 = vsel %vm233_vm9, nan, %v552_v61  ;;  %v243_v7 = vsel %vm233_vm9, nan, %v242_v4 }
  0xf6   :  { %v391_v3 = vxor.u32 2147483648, %v386_v1  ;;  %v706_v9 = vsel %vm704_vm7, %v394_v2, %v386_v1  ;;  %v395_v15 = vsel %vm393_vm8, %v394_v2, %v386_v1 }
  0xf8   :  { %v703_v8 = vsel %vm701_vm6, %v378_v63, %v391_v3  ;;  %v392_v11 = vsel %vm390_vm5, %v378_v63, %v391_v3 }
  0xf9   :  { %v707_v21 = vsel %vm700_vm3, %v703_v8, %v706_v9  ;;  %v396_v22 = vsel %vm389_vm4, %v392_v11, %v395_v15 }
  0xfa   :  { %v708_v39 = vsel %vm387_vm10, nan, %v707_v21  ;;  %v397_v26 = vsel %vm387_vm10, nan, %v396_v22 }
  0xfb   :  { %v709_v38 = vpack.c.bf16 %v708_v39, %v553_v24  ;;  %v398_v30 = vpack.c.bf16 %v397_v26, %v243_v7 }
  0xfd   :  { %798 = vmatmul.bf16.vlgmr.msra.gmra.mxu2 %v709_v38  ;;  %860 = vmatmul.bf16.vlgmr.msra.gmra.mxu3 %v398_v30 }
 0x180   :  { %v799_v41 = vpop.f32.mrf.mxu2  ;;  %v861_v12 = vpop.f32.mrf.mxu3 }
 0x181   :  { %v862_v16 = vadd.f32 %v861_v12, %v799_v41 }
 0x183   :  { %v870_v20 = vadd.f32 %v999_v37, %v862_v16 }
 0x185   :  { %873 = vst.msk [vmem:[#allocation2] sm:$0xff] %vm872_vm11, %v870_v20 }
 0x188   :  { %v801_v42 = vpop.f32.mrf.mxu2  ;;  %v863_v40 = vpop.f32.mrf.mxu3 }
 0x189   :  { %v864_v43 = vadd.f32 %v863_v40, %v801_v42 }
 0x18b   :  { %v871_v45 = vadd.f32 %v999_v37, %v864_v43 }
 0x18d   :  { %874 = vst.msk [vmem:[#allocation2 + $0x8] sm:$0xff] %vm872_vm11, %v871_v45 }
 0x18e   :  { %887 = dma.vmem_to_hbm [thread:$0]  %s880_s30, 256, %s882_s8, [#allocation3], %s1034_s4, %s1034_s4, %s1035_s9  }
 0x18f   :  { %1024 = dma.done.wait [#allocation3], 256  }
 0x190   :  { %1025 = vsyncadd [#allocation3], 4294967040 }
 0x191   :  { %892 = vsyncpa [#allocation3], 1 }

</bundles_post_ra>
